<compile_context>
chip_gen: v7x
topology: tpu7x:2x2x1
jax: 0.10.0
libtpu: 0.0.40
codegen_flags: <defaults>
</compile_context>

<pallas_src>
import math

import jax
import jax.numpy as jnp
from jax.experimental import pallas as pl
from jax.experimental.pallas import tpu as pltpu

_SQRT_2_OVER_PI = math.sqrt(2.0 / math.pi)
_A = _SQRT_2_OVER_PI                 # coefficient of x
_B = 0.044715 * _SQRT_2_OVER_PI      # coefficient of x^3

_LANE_CHOICES = (4096, 2048, 1024, 512, 256, 128)
_ALIGN = 8 * 128                     # smallest (sublane, lane) granule in elems


def _gelu_kernel(x_ref, o_ref):
    # Compute in f32 (v5e VPU/EUP have no bf16 path; keeps the cubic polynomial
    # accurate for narrow input dtypes); cast only on store.
    x = x_ref[...].astype(jnp.float32)
    inner = x * (_A + _B * (x * x))          # == sqrt(2/pi) * (x + 0.044715*x^3)
    o_ref[...] = (0.5 * x * (1.0 + jnp.tanh(inner))).astype(o_ref.dtype)


def _gelu_jnp(x):
    """Plain-JAX GELU (tanh form) for tiny unaligned tails."""
    xf = x.astype(jnp.float32)
    inner = xf * (_A + _B * (xf * xf))
    return (0.5 * xf * (1.0 + jnp.tanh(inner))).astype(x.dtype)


def _chip_config():
    """(block_bytes, vmem_limit_bytes, tensorcores_per_chip) per TPU generation."""
    try:
        kind = jax.devices()[0].device_kind.lower()
    except Exception:
        kind = ""
    if "v7" in kind:
        # 64 MiB physical VMEM, 2 TCs, 3.2 TB/s HBM: 8 MiB blocks, even grids.
        return 8 << 20, 40 << 20, 2
    if "v6" in kind:
        # 128 MiB VMEM, 1 TC, ~1.4 TB/s: go big, no split needed.
        return 16 << 20, 64 << 20, 1
    if "v5p" in kind or "v4" in kind:
        # megacore parts: 2 TCs share the grid.
        return 8 << 20, 48 << 20, 2
    if "v5" in kind:
        # v5e: single TC, 128 MiB VMEM but keep allocation modest.
        return 8 << 20, 48 << 20, 1
    # Unknown / fallback: conservative.
    return 4 << 20, 32 << 20, 1


def _pick_block_rows(rows: int, lane: int, itemsize: int,
                     block_bytes: int, num_cores: int) -> int:
    """Block row count: multiple of 8, under the per-block VMEM budget,
    preferring an exact divisor of `rows` (no masked last block) and, on
    dual-TensorCore chips, an even grid length so both cores stay busy."""
    if rows <= 8:
        return rows                                   # single full-array block
    budget_rows = max(8, (block_bytes // (lane * itemsize)) // 8 * 8)

    if budget_rows >= rows:
        if num_cores <= 1:
            return rows                               # one full block; no split
        # dual-TC: split into exactly 2 blocks.
        half = -(-rows // 2)
        return min(rows, max(8, -(-half // 8) * 8))

    # rows > budget: largest multiple-of-8 divisor of rows under the budget
    # (even grid on dual-TC parts).
    want_even = num_cores > 1
    best = None
    i = 1
    while i * i <= rows:
        if rows % i == 0:
            for d in (i, rows // i):
                if d % 8 == 0 and d <= budget_rows:
                    if want_even and (rows // d) % 2 != 0:
                        continue
                    if best is None or d > best:
                        best = d
        i += 1
    if best is not None:
        return best

    # Fallback: budget-sized blocks; on dual-TC shrink until the grid is even.
    b = budget_rows
    if want_even:
        while b > 8 and (-(-rows // b)) % 2 != 0:
            b -= 8
    return b


def _gelu_2d(x2d, rows, lane, dtype, block_bytes, vmem_limit, num_cores):
    itemsize = jnp.dtype(dtype).itemsize
    block_rows = _pick_block_rows(rows, lane, itemsize, block_bytes, num_cores)
    grid = (pl.cdiv(rows, block_rows),)
    return pl.pallas_call(
        _gelu_kernel,
        out_shape=jax.ShapeDtypeStruct((rows, lane), dtype),
        grid_spec=pltpu.PrefetchScalarGridSpec(
            num_scalar_prefetch=0,
            grid=grid,
            in_specs=[pl.BlockSpec((block_rows, lane), lambda i: (i, 0))],
            out_specs=pl.BlockSpec((block_rows, lane), lambda i: (i, 0)),
        ),
        compiler_params=pltpu.CompilerParams(
            dimension_semantics=("parallel",),
            vmem_limit_bytes=vmem_limit,
        ),
    )(x2d)


@jax.jit
def gelu_pallas(x: jax.Array) -> jax.Array:
    orig_shape = x.shape
    dtype = x.dtype
    n = x.size
    if n == 0:
        return x

    block_bytes, vmem_limit, num_cores = _chip_config()

    # Lane-dense 2D view: widest lane (multiple of 128) dividing the element
    # count exactly -> no padding, no extra HBM copies.
    lane = next((c for c in _LANE_CHOICES if n % c == 0), None)

    if lane is not None:
        rows = n // lane
        x2d = jnp.ravel(x).reshape(rows, lane)
        out2d = _gelu_2d(x2d, rows, lane, dtype,
                         block_bytes, vmem_limit, num_cores)
        return out2d.reshape(orig_shape)

    # Element count not a multiple of 128: run the kernel on the aligned prefix
    # and handle the (<1024-elem) tail in plain jnp — avoids a full-array pad
    # copy that would double HBM traffic on this bandwidth-bound op.
    x_flat = jnp.ravel(x)
    n_main = (n // _ALIGN) * _ALIGN
    if n_main == 0:
        return _gelu_jnp(x)                           # tiny input: plain jnp
    lane_m = next(c for c in _LANE_CHOICES if n_main % c == 0)
    rows_m = n_main // lane_m
    main2d = x_flat[:n_main].reshape(rows_m, lane_m)
    out_main = _gelu_2d(main2d, rows_m, lane_m, dtype,
                        block_bytes, vmem_limit, num_cores)
    out_tail = _gelu_jnp(x_flat[n_main:])
    return jnp.concatenate([out_main.reshape(-1), out_tail]).reshape(orig_shape)


def gelu_reference(x: jax.Array) -> jax.Array:
    return 0.5 * x * (1.0 + jnp.tanh(_SQRT_2_OVER_PI * (x + 0.044715 * x ** 3)))


if __name__ == "__main__":
    key = jax.random.PRNGKey(0)

    # NCHW input, same convention as the PyTorch module.
    x = jax.random.normal(key, (2, 4, 16, 16), dtype=jnp.float32)
    out = jax.block_until_ready(gelu_pallas(x))
    ref = gelu_reference(x)
    assert out.shape == x.shape and out.dtype == x.dtype
    assert jnp.allclose(out, ref, atol=1e-5, rtol=1e-5), "mismatch vs reference"

    # Also exercise the unaligned (bulk + tail) path.
    x_odd = jax.random.normal(jax.random.PRNGKey(1), (3, 5, 7, 11),
                              dtype=jnp.float32)
    out_odd = jax.block_until_ready(gelu_pallas(x_odd))
    ref_odd = gelu_reference(x_odd)
    assert out_odd.shape == x_odd.shape
    assert jnp.allclose(out_odd, ref_odd, atol=1e-5, rtol=1e-5), "tail mismatch"

    print("KERNEL_OK")
</pallas_src>

<mosaic_0001>
module attributes {stable_mosaic.version = 11 : i64} {
  func.func @_gelu_kernel(%arg0: i32, %arg1: memref<1x2048xf32, #tpu.memory_space<vmem>>, %arg2: memref<1x2048xf32, #tpu.memory_space<vmem>>) attributes {dimension_semantics = [#tpu.dimension_semantics<parallel>], iteration_bounds = array<i64: 1>, scalar_prefetch = 0 : i64, scratch_operands = 0 : i64, tpu.core_type = #tpu.core_type<tc>, window_params = [{transform_indices = @transform_0, window_bounds = array<i64: 1, 2048>}, {transform_indices = @transform_1, window_bounds = array<i64: 1, 2048>}]} {
    %c0 = arith.constant 0 : index
    %c0_0 = arith.constant 0 : index
    %0 = vector.load %arg1[%c0, %c0_0] : memref<1x2048xf32, #tpu.memory_space<vmem>>, vector<1x2048xf32>
    %1 = arith.mulf %0, %0 : vector<1x2048xf32>
    %cst = arith.constant 0.0356774069 : f32
    %2 = vector.broadcast %cst : f32 to vector<1x2048xf32>
    %3 = arith.mulf %2, %1 : vector<1x2048xf32>
    %cst_1 = arith.constant 0.797884583 : f32
    %4 = vector.broadcast %cst_1 : f32 to vector<1x2048xf32>
    %5 = arith.addf %4, %3 : vector<1x2048xf32>
    %6 = arith.mulf %0, %5 : vector<1x2048xf32>
    %cst_2 = arith.constant 5.000000e-01 : f32
    %7 = vector.broadcast %cst_2 : f32 to vector<1x2048xf32>
    %8 = arith.mulf %7, %0 : vector<1x2048xf32>
    %9 = math.tanh %6 : vector<1x2048xf32>
    %cst_3 = arith.constant 1.000000e+00 : f32
    %10 = vector.broadcast %cst_3 : f32 to vector<1x2048xf32>
    %11 = arith.addf %10, %9 : vector<1x2048xf32>
    %12 = arith.mulf %8, %11 : vector<1x2048xf32>
    %c0_4 = arith.constant 0 : index
    %c0_5 = arith.constant 0 : index
    %13 = vector.load %arg2[%c0_4, %c0_5] : memref<1x2048xf32, #tpu.memory_space<vmem>>, vector<1x2048xf32>
    tpu.vector_store %arg2[%c0_4, %c0_5], %12 {strides = array<i32>} : memref<1x2048xf32, #tpu.memory_space<vmem>>, vector<1x2048xf32>,
    return
  }
  func.func @transform_0(%arg0: i32) -> (i32, i32) {
    %c0_i32 = arith.constant 0 : i32
    %c0_i32_0 = arith.constant 0 : i32
    return %arg0, %c0_i32 : i32, i32
  }
  func.func @transform_1(%arg0: i32) -> (i32, i32) {
    %c0_i32 = arith.constant 0 : i32
    %c0_i32_0 = arith.constant 0 : i32
    return %arg0, %c0_i32 : i32, i32
  }
}

</mosaic_0001>

<bundles_post_ra>
// kernel: gelu_pallas.1
= control target key start
LH: loop header
LB: loop body
LE: loop exit
PB: predicated region body
PF: predicated region fallthrough
CT: control target
= control target key end

     0   :  { %s58_s0 = inlined_call_operand.vmem [shape: f32[1,2048], index: 0, kind: input, shape index: {}]   ;;  %s59_s1 = inlined_call_operand.vmem [shape: f32[1,2048], index: 1, kind: output, shape index: {}]  }
   0x1   :  { %v8_v0 = vld [vmem:[%s58_s0] sm:$0xff]  ;;  %v9_v1 = vld [vmem:[%s58_s0 + $0x8] sm:$0xff] }
   0x2   :  { %v10_v2 = vmul.f32 %v8_v0, %v8_v0  ;;  %v11_v3 = vmul.f32 %v9_v1, %v9_v1  ;;  %v18_v10 = vmul.f32 0.5, %v8_v0  ;;  %v19_v12 = vmul.f32 0.5, %v9_v1 }
   0x4   :  { %v12_v4 = vmul.f32 0.035677407, %v10_v2  ;;  %v13_v5 = vmul.f32 0.035677407, %v11_v3 }
   0x6   :  { %v14_v6 = vadd.f32 0.7978846, %v12_v4  ;;  %v15_v7 = vadd.f32 0.7978846, %v13_v5 }
   0x8   :  { %v16_v8 = vmul.f32 %v14_v6, %v8_v0  ;;  %v17_v9 = vmul.f32 %v15_v7, %v9_v1 }
   0xa   :  { %32 = vtanh.f32 %v16_v8 }
   0xb   :  { %34 = vtanh.f32 %v17_v9 }
  0x14   :  { %v33_v11 = vpop.eup %32 }
  0x15   :  { %v35_v13 = vpop.eup %34  ;;  %v22_v14 = vadd.f32 1.0, %v33_v11 }
  0x16   :  { %v23_v15 = vadd.f32 1.0, %v35_v13 }
  0x17   :  { %v24_v16 = vmul.f32 %v22_v14, %v18_v10 }
  0x18   :  { %v25_v17 = vmul.f32 %v23_v15, %v19_v12 }
  0x19   :  { %26 = vst [vmem:[%s59_s1] sm:$0xff] %v24_v16 }
  0x1a   :  { %27 = vst [vmem:[%s59_s1 + $0x8] sm:$0xff] %v25_v17 }

</bundles_post_ra>
